<compile_context>
chip_gen: v7x
topology: tpu7x:2x2x1
jax: 0.10.0
libtpu: 0.0.40
codegen_flags: <defaults>
</compile_context>

<pallas_src>
import functools

import numpy as np
import jax
import jax.numpy as jnp
from jax.experimental import pallas as pl
from jax.experimental.pallas import tpu as pltpu

SCALE = 0.5 ** 0.5


# ----------------------------------------------------------------------------
# Pallas kernel: grid = (batch, layer).  One grid step == one _ResLayer applied
# to one batch element.  Running x lives in VMEM scratch across the layer axis;
# the output block (add_up) is a resident accumulator across the layer axis.
# ----------------------------------------------------------------------------
def _tinypa_kernel(x_ref, w1_ref, b1_ref, w2_ref, b2_ref,
                   fw1_ref, fb1_ref, fw2_ref, fb2_ref,
                   out_ref, xstate_ref, pad_ref,
                   *, H, W, C, K, pad, n_taps):
    layer = pl.program_id(1)

    @pl.when(layer == 0)
    def _():
        xin = x_ref[0]                 # (H*W, C) f32
        xstate_ref[...] = xin          # running x
        out_ref[0] = xin               # add_up starts as the input

    x = xstate_ref[...]                # (H*W, C) f32
    residual = x

    # conv1 (1x1): per-position channel matmul (bf16 operands, f32 accum).
    y = jnp.dot(x.astype(jnp.bfloat16), w1_ref[0],
                preferred_element_type=jnp.float32) + b1_ref[0]

    # mconv2: masked KxK conv.  Zero-padded conv1 output in VMEM scratch,
    # static shifted slices for each active (causal) tap, all taps fused into
    # a single wide-contraction matmul (H*W, n_taps*C) x (n_taps*C, C).
    pad_ref[...] = jnp.zeros_like(pad_ref)
    pad_ref[pl.ds(pad, H), pl.ds(pad, W), :] = y.reshape(H, W, C)
    taps = []
    for kh in range(K):
        if kh > K // 2:
            continue                   # causal mask along the target axis
        for kw in range(K):
            taps.append(pad_ref[pl.ds(kh, H), pl.ds(kw, W), :])
    ycat = jnp.concatenate(taps, axis=-1).reshape(H * W, n_taps * C)
    z = jnp.dot(ycat.astype(jnp.bfloat16), w2_ref[0],
                preferred_element_type=jnp.float32) + b2_ref[0]

    x = SCALE * (z + residual)
    residual = x

    # FFN: fc1 -> relu -> fc2 (bf16 matmul operands, f32 elementwise path).
    h = jnp.dot(x.astype(jnp.bfloat16), fw1_ref[0],
                preferred_element_type=jnp.float32) + fb1_ref[0]
    h = jnp.maximum(h, 0.0)
    o = jnp.dot(h.astype(jnp.bfloat16), fw2_ref[0],
                preferred_element_type=jnp.float32) + fb2_ref[0]
    x = SCALE * (o + residual)

    xstate_ref[...] = x
    out_ref[0] = out_ref[0] + x        # add_up += x


# ----------------------------------------------------------------------------
# Glue: parameter init, wrapper, reference.
# ----------------------------------------------------------------------------
def init_params(key, L, C, K):
    H4 = 4 * C
    ks = jax.random.split(key, 6)

    def xavier(k, shape, fan_in, fan_out):
        bound = (6.0 / (fan_in + fan_out)) ** 0.5
        return jax.random.uniform(k, shape, jnp.float32, -bound, bound)

    # conv1 (1x1): weight stored transposed as (C_in, C_out)
    w1 = xavier(ks[0], (L, C, C), C, C)
    b1 = 0.01 * jax.random.normal(ks[1], (L, 1, C), jnp.float32)
    # masked conv: (L, K, K, C_in, C_out); zero the future target rows
    w2 = xavier(ks[2], (L, K, K, C, C), C * K * K, C)
    mask = (jnp.arange(K) <= K // 2).astype(jnp.float32)[None, :, None, None, None]
    w2 = w2 * mask
    b2 = 0.01 * jax.random.normal(ks[3], (L, 1, C), jnp.float32)
    # fc1 / fc2: xavier weights, zero biases (per the Linear() helper)
    fw1 = xavier(ks[4], (L, C, H4), C, H4)
    fb1 = jnp.zeros((L, 1, H4), jnp.float32)
    fw2 = xavier(ks[5], (L, H4, C), H4, C)
    fb2 = jnp.zeros((L, 1, C), jnp.float32)
    return (w1, b1, w2, b2, fw1, fb1, fw2, fb2)


def tinypa_forward(x, params, *, kernel_size=3):
    B, H, W, C = x.shape
    w1, b1, w2, b2, fw1, fb1, fw2, fb2 = params
    L = w1.shape[0]
    K = kernel_size
    pad = (K - 1) // 2
    HW = H * W
    H4 = fw1.shape[-1]

    # Fuse the active (causal) taps of the masked conv into one wide matmul.
    # Concatenation order must match the kernel's tap concatenation order.
    taps = [(kh, kw) for kh in range(K) if kh <= K // 2 for kw in range(K)]
    n_taps = len(taps)
    w2cat = jnp.concatenate([w2[:, kh, kw] for (kh, kw) in taps], axis=1)  # (L, n_taps*C, C)

    # bf16 weights for native-rate MXU matmuls; biases / elementwise stay f32.
    w1b = w1.astype(jnp.bfloat16)
    w2b = w2cat.astype(jnp.bfloat16)
    fw1b = fw1.astype(jnp.bfloat16)
    fw2b = fw2.astype(jnp.bfloat16)

    xf = x.reshape(B, HW, C).astype(jnp.float32)

    kernel = functools.partial(_tinypa_kernel, H=H, W=W, C=C, K=K,
                               pad=pad, n_taps=n_taps)
    grid_spec = pltpu.PrefetchScalarGridSpec(
        num_scalar_prefetch=0,
        grid=(B, L),
        in_specs=[
            pl.BlockSpec((1, HW, C), lambda b, l: (b, 0, 0)),          # x (per batch)
            pl.BlockSpec((1, C, C), lambda b, l: (l, 0, 0)),           # conv1 w (bf16)
            pl.BlockSpec((1, 1, C), lambda b, l: (l, 0, 0)),           # conv1 b
            pl.BlockSpec((1, n_taps * C, C), lambda b, l: (l, 0, 0)),  # fused mconv w (bf16)
            pl.BlockSpec((1, 1, C), lambda b, l: (l, 0, 0)),           # mconv b
            pl.BlockSpec((1, C, H4), lambda b, l: (l, 0, 0)),          # fc1 w (bf16)
            pl.BlockSpec((1, 1, H4), lambda b, l: (l, 0, 0)),          # fc1 b
            pl.BlockSpec((1, H4, C), lambda b, l: (l, 0, 0)),          # fc2 w (bf16)
            pl.BlockSpec((1, 1, C), lambda b, l: (l, 0, 0)),           # fc2 b
        ],
        out_specs=pl.BlockSpec((1, HW, C), lambda b, l: (b, 0, 0)),
        scratch_shapes=[
            pltpu.VMEM((HW, C), jnp.float32),                          # running x
            pltpu.VMEM((H + 2 * pad, W + 2 * pad, C), jnp.float32),    # padded conv1 out
        ],
    )
    out_flat = pl.pallas_call(
        kernel,
        out_shape=jax.ShapeDtypeStruct((B, HW, C), jnp.float32),
        grid_spec=grid_spec,
        compiler_params=pltpu.CompilerParams(
            # batch axis can shard across TensorCores (v7x); layers sequential
            dimension_semantics=("parallel", "arbitrary")),
    )(xf, w1b, b1, w2b, b2, fw1b, fb1, fw2b, fb2)
    return out_flat.reshape(B, H, W, C)


def tinypa_reference(x, params, K):
    """Pure-JAX eval-mode reference mirroring the kernel numerics
    (bf16 matmul operands, f32 accumulation and elementwise path)."""
    w1, b1, w2, b2, fw1, fb1, fw2, fb2 = params
    B, H, W, C = x.shape
    L = w1.shape[0]
    pad = (K - 1) // 2
    bf = jnp.bfloat16

    def mm(a, w):
        return jnp.dot(a.astype(bf), w.astype(bf),
                       preferred_element_type=jnp.float32)

    x = x.astype(jnp.float32)
    add_up = x
    for l in range(L):
        residual = x
        y = (mm(x.reshape(-1, C), w1[l]) + b1[l]).reshape(B, H, W, C)
        yp = jnp.pad(y, ((0, 0), (pad, pad), (pad, pad), (0, 0)))
        acc = jnp.zeros((B * H * W, C), jnp.float32)
        for kh in range(K):
            if kh > K // 2:
                continue
            for kw in range(K):
                ys = yp[:, kh:kh + H, kw:kw + W, :].reshape(-1, C)
                acc = acc + mm(ys, w2[l, kh, kw])
        z = (acc + b2[l]).reshape(B, H, W, C)
        x = SCALE * (z + residual)
        residual = x
        h = jnp.maximum(mm(x.reshape(-1, C), fw1[l]) + fb1[l], 0.0)
        o = mm(h, fw2[l]) + fb2[l]
        x = SCALE * (o.reshape(B, H, W, C) + residual)
        add_up = add_up + x
    return add_up


if __name__ == "__main__":
    B, Tt, Ts, C = 2, 8, 8, 16      # batch, target len, source len, num_features
    num_layers, kernel_size = 3, 3

    key = jax.random.PRNGKey(0)
    kx, kp = jax.random.split(key)
    x = jax.random.normal(kx, (B, Tt, Ts, C), jnp.float32)
    params = init_params(kp, num_layers, C, kernel_size)

    out = tinypa_forward(x, params, kernel_size=kernel_size)
    out = jax.block_until_ready(out)

    ref = tinypa_reference(x, params, kernel_size)
    assert out.shape == (B, Tt, Ts, C)
    err = float(jnp.max(jnp.abs(out - ref)))
    if not np.isfinite(err) or err > 2e-2:
        raise AssertionError(f"kernel/reference mismatch, max abs err = {err}")
    print("KERNEL_OK")
</pallas_src>

<mosaic_0001>
module attributes {stable_mosaic.version = 11 : i64} {
  func.func @_tinypa_kernel(%arg0: i32, %arg1: i32, %arg2: memref<1x64x16xf32, #tpu.memory_space<vmem>>, %arg3: memref<1x16x16xbf16, #tpu.memory_space<vmem>>, %arg4: memref<1x1x16xf32, #tpu.memory_space<vmem>>, %arg5: memref<1x96x16xbf16, #tpu.memory_space<vmem>>, %arg6: memref<1x1x16xf32, #tpu.memory_space<vmem>>, %arg7: memref<1x16x64xbf16, #tpu.memory_space<vmem>>, %arg8: memref<1x1x64xf32, #tpu.memory_space<vmem>>, %arg9: memref<1x64x16xbf16, #tpu.memory_space<vmem>>, %arg10: memref<1x1x16xf32, #tpu.memory_space<vmem>>, %arg11: memref<1x64x16xf32, #tpu.memory_space<vmem>>, %arg12: memref<64x16xf32, #tpu.memory_space<vmem>>, %arg13: memref<10x10x16xf32, #tpu.memory_space<vmem>>) attributes {dimension_semantics = [#tpu.dimension_semantics<parallel>, #tpu.dimension_semantics<arbitrary>], iteration_bounds = array<i64: 2, 3>, scalar_prefetch = 0 : i64, scratch_operands = 2 : i64, tpu.core_type = #tpu.core_type<tc>, window_params = [{transform_indices = @transform_0, window_bounds = array<i64: 1, 64, 16>}, {transform_indices = @transform_1, window_bounds = array<i64: 1, 16, 16>}, {transform_indices = @transform_2, window_bounds = array<i64: 1, 1, 16>}, {transform_indices = @transform_3, window_bounds = array<i64: 1, 96, 16>}, {transform_indices = @transform_4, window_bounds = array<i64: 1, 1, 16>}, {transform_indices = @transform_5, window_bounds = array<i64: 1, 16, 64>}, {transform_indices = @transform_6, window_bounds = array<i64: 1, 1, 64>}, {transform_indices = @transform_7, window_bounds = array<i64: 1, 64, 16>}, {transform_indices = @transform_8, window_bounds = array<i64: 1, 1, 16>}, {transform_indices = @transform_9, window_bounds = array<i64: 1, 64, 16>}]} {
    %c0_i32 = arith.constant 0 : i32
    %0 = arith.cmpi eq, %arg1, %c0_i32 : i32
    %1 = arith.extui %0 : i1 to i32
    %c0_i32_0 = arith.constant 0 : i32
    %2 = arith.cmpi ne, %1, %c0_i32_0 : i32
    scf.if %2 {
      %c0_63 = arith.constant 0 : index
      %c0_64 = arith.constant 0 : index
      %c0_65 = arith.constant 0 : index
      %63 = vector.load %arg2[%c0_63, %c0_64, %c0_65] : memref<1x64x16xf32, #tpu.memory_space<vmem>>, vector<1x64x16xf32>
      %64 = vector.shape_cast %63 : vector<1x64x16xf32> to vector<64x16xf32>
      %c0_66 = arith.constant 0 : index
      %c0_67 = arith.constant 0 : index
      %65 = vector.load %arg12[%c0_66, %c0_67] : memref<64x16xf32, #tpu.memory_space<vmem>>, vector<64x16xf32>
      tpu.vector_store %arg12[%c0_66, %c0_67], %64 {strides = array<i32>} : memref<64x16xf32, #tpu.memory_space<vmem>>, vector<64x16xf32>,
      %c0_68 = arith.constant 0 : index
      %c0_69 = arith.constant 0 : index
      %c0_70 = arith.constant 0 : index
      %66 = vector.load %arg11[%c0_68, %c0_69, %c0_70] : memref<1x64x16xf32, #tpu.memory_space<vmem>>, vector<1x64x16xf32>
      %67 = vector.shape_cast %66 : vector<1x64x16xf32> to vector<64x16xf32>
      %68 = vector.shape_cast %64 : vector<64x16xf32> to vector<1x64x16xf32>
      tpu.vector_store %arg11[%c0_68, %c0_69, %c0_70], %68 {strides = array<i32>} : memref<1x64x16xf32, #tpu.memory_space<vmem>>, vector<1x64x16xf32>,
    } else {
    }
    %c0 = arith.constant 0 : index
    %c0_1 = arith.constant 0 : index
    %3 = vector.load %arg12[%c0, %c0_1] : memref<64x16xf32, #tpu.memory_space<vmem>>, vector<64x16xf32>
    %4 = arith.truncf %3 : vector<64x16xf32> to vector<64x16xbf16>
    %c0_2 = arith.constant 0 : index
    %c0_3 = arith.constant 0 : index
    %c0_4 = arith.constant 0 : index
    %5 = vector.load %arg3[%c0_2, %c0_3, %c0_4] : memref<1x16x16xbf16, #tpu.memory_space<vmem>>, vector<1x16x16xbf16>
    %6 = vector.shape_cast %5 : vector<1x16x16xbf16> to vector<16x16xbf16>
    %cst = arith.constant dense<0.000000e+00> : vector<64x16xf32>
    %7 = tpu.matmul %4, %6, %cst {dimension_numbers = #tpu.dot_dimension_numbers<[1], [0], [0], [1], [0, 0, 1, 1], [], []>} : vector<64x16xbf16>, vector<16x16xbf16>, vector<64x16xf32> -> vector<64x16xf32>
    %c0_5 = arith.constant 0 : index
    %c0_6 = arith.constant 0 : index
    %c0_7 = arith.constant 0 : index
    %8 = vector.load %arg4[%c0_5, %c0_6, %c0_7] : memref<1x1x16xf32, #tpu.memory_space<vmem>>, vector<1x1x16xf32>
    %9 = vector.shape_cast %8 : vector<1x1x16xf32> to vector<1x16xf32>
    %10 = vector.broadcast %9 : vector<1x16xf32> to vector<64x16xf32>
    %11 = arith.addf %7, %10 : vector<64x16xf32>
    %cst_8 = arith.constant 0.000000e+00 : f32
    %12 = vector.broadcast %cst_8 : f32 to vector<10x10x16xf32>
    %c0_9 = arith.constant 0 : index
    %c0_10 = arith.constant 0 : index
    %c0_11 = arith.constant 0 : index
    %13 = vector.load %arg13[%c0_9, %c0_10, %c0_11] : memref<10x10x16xf32, #tpu.memory_space<vmem>>, vector<10x10x16xf32>
    tpu.vector_store %arg13[%c0_9, %c0_10, %c0_11], %12 {strides = array<i32>} : memref<10x10x16xf32, #tpu.memory_space<vmem>>, vector<10x10x16xf32>,
    %14 = vector.shape_cast %11 : vector<64x16xf32> to vector<8x8x16xf32>
    %c1 = arith.constant 1 : index
    %c1_12 = arith.constant 1 : index
    %c0_13 = arith.constant 0 : index
    %15 = vector.load %arg13[%c1, %c1_12, %c0_13] : memref<10x10x16xf32, #tpu.memory_space<vmem>>, vector<8x8x16xf32>
    tpu.vector_store %arg13[%c1, %c1_12, %c0_13], %14 {strides = array<i32>} : memref<10x10x16xf32, #tpu.memory_space<vmem>>, vector<8x8x16xf32>,
    %c0_14 = arith.constant 0 : index
    %c0_15 = arith.constant 0 : index
    %c0_16 = arith.constant 0 : index
    %16 = vector.load %arg13[%c0_14, %c0_15, %c0_16] : memref<10x10x16xf32, #tpu.memory_space<vmem>>, vector<8x8x16xf32>
    %c0_17 = arith.constant 0 : index
    %c1_18 = arith.constant 1 : index
    %c0_19 = arith.constant 0 : index
    %17 = vector.load %arg13[%c0_17, %c1_18, %c0_19] : memref<10x10x16xf32, #tpu.memory_space<vmem>>, vector<8x8x16xf32>
    %c0_20 = arith.constant 0 : index
    %c2 = arith.constant 2 : index
    %c0_21 = arith.constant 0 : index
    %18 = vector.load %arg13[%c0_20, %c2, %c0_21] : memref<10x10x16xf32, #tpu.memory_space<vmem>>, vector<8x8x16xf32>
    %c1_22 = arith.constant 1 : index
    %c0_23 = arith.constant 0 : index
    %c0_24 = arith.constant 0 : index
    %19 = vector.load %arg13[%c1_22, %c0_23, %c0_24] : memref<10x10x16xf32, #tpu.memory_space<vmem>>, vector<8x8x16xf32>
    %c1_25 = arith.constant 1 : index
    %c1_26 = arith.constant 1 : index
    %c0_27 = arith.constant 0 : index
    %20 = vector.load %arg13[%c1_25, %c1_26, %c0_27] : memref<10x10x16xf32, #tpu.memory_space<vmem>>, vector<8x8x16xf32>
    %c1_28 = arith.constant 1 : index
    %c2_29 = arith.constant 2 : index
    %c0_30 = arith.constant 0 : index
    %21 = vector.load %arg13[%c1_28, %c2_29, %c0_30] : memref<10x10x16xf32, #tpu.memory_space<vmem>>, vector<8x8x16xf32>
    %22 = tpu.concatenate %16, %17, %18, %19, %20, %21 in 2 : vector<8x8x16xf32>, vector<8x8x16xf32>, vector<8x8x16xf32>, vector<8x8x16xf32>, vector<8x8x16xf32>, vector<8x8x16xf32> -> vector<8x8x96xf32>
    %23 = vector.shape_cast %22 : vector<8x8x96xf32> to vector<64x96xf32>
    %24 = arith.truncf %23 : vector<64x96xf32> to vector<64x96xbf16>
    %c0_31 = arith.constant 0 : index
    %c0_32 = arith.constant 0 : index
    %c0_33 = arith.constant 0 : index
    %25 = vector.load %arg5[%c0_31, %c0_32, %c0_33] : memref<1x96x16xbf16, #tpu.memory_space<vmem>>, vector<1x96x16xbf16>
    %26 = vector.shape_cast %25 : vector<1x96x16xbf16> to vector<96x16xbf16>
    %cst_34 = arith.constant dense<0.000000e+00> : vector<64x16xf32>
    %27 = tpu.matmul %24, %26, %cst_34 {dimension_numbers = #tpu.dot_dimension_numbers<[1], [0], [0], [1], [0, 0, 1, 1], [], []>} : vector<64x96xbf16>, vector<96x16xbf16>, vector<64x16xf32> -> vector<64x16xf32>
    %c0_35 = arith.constant 0 : index
    %c0_36 = arith.constant 0 : index
    %c0_37 = arith.constant 0 : index
    %28 = vector.load %arg6[%c0_35, %c0_36, %c0_37] : memref<1x1x16xf32, #tpu.memory_space<vmem>>, vector<1x1x16xf32>
    %29 = vector.shape_cast %28 : vector<1x1x16xf32> to vector<1x16xf32>
    %30 = vector.broadcast %29 : vector<1x16xf32> to vector<64x16xf32>
    %31 = arith.addf %27, %30 : vector<64x16xf32>
    %32 = arith.addf %31, %3 : vector<64x16xf32>
    %cst_38 = arith.constant 0.707106769 : f32
    %33 = vector.broadcast %cst_38 : f32 to vector<64x16xf32>
    %34 = arith.mulf %33, %32 : vector<64x16xf32>
    %35 = arith.truncf %34 : vector<64x16xf32> to vector<64x16xbf16>
    %c0_39 = arith.constant 0 : index
    %c0_40 = arith.constant 0 : index
    %c0_41 = arith.constant 0 : index
    %36 = vector.load %arg7[%c0_39, %c0_40, %c0_41] : memref<1x16x64xbf16, #tpu.memory_space<vmem>>, vector<1x16x64xbf16>
    %37 = vector.shape_cast %36 : vector<1x16x64xbf16> to vector<16x64xbf16>
    %cst_42 = arith.constant dense<0.000000e+00> : vector<64x64xf32>
    %38 = tpu.matmul %35, %37, %cst_42 {dimension_numbers = #tpu.dot_dimension_numbers<[1], [0], [0], [1], [0, 0, 1, 1], [], []>} : vector<64x16xbf16>, vector<16x64xbf16>, vector<64x64xf32> -> vector<64x64xf32>
    %c0_43 = arith.constant 0 : index
    %c0_44 = arith.constant 0 : index
    %c0_45 = arith.constant 0 : index
    %39 = vector.load %arg8[%c0_43, %c0_44, %c0_45] : memref<1x1x64xf32, #tpu.memory_space<vmem>>, vector<1x1x64xf32>
    %40 = vector.shape_cast %39 : vector<1x1x64xf32> to vector<1x64xf32>
    %41 = vector.broadcast %40 : vector<1x64xf32> to vector<64x64xf32>
    %42 = arith.addf %38, %41 : vector<64x64xf32>
    %cst_46 = arith.constant 0.000000e+00 : f32
    %43 = vector.broadcast %cst_46 : f32 to vector<64x64xf32>
    %44 = arith.maximumf %42, %43 : vector<64x64xf32>
    %45 = arith.truncf %44 : vector<64x64xf32> to vector<64x64xbf16>
    %c0_47 = arith.constant 0 : index
    %c0_48 = arith.constant 0 : index
    %c0_49 = arith.constant 0 : index
    %46 = vector.load %arg9[%c0_47, %c0_48, %c0_49] : memref<1x64x16xbf16, #tpu.memory_space<vmem>>, vector<1x64x16xbf16>
    %47 = vector.shape_cast %46 : vector<1x64x16xbf16> to vector<64x16xbf16>
    %cst_50 = arith.constant dense<0.000000e+00> : vector<64x16xf32>
    %48 = tpu.matmul %45, %47, %cst_50 {dimension_numbers = #tpu.dot_dimension_numbers<[1], [0], [0], [1], [0, 0, 1, 1], [], []>} : vector<64x64xbf16>, vector<64x16xbf16>, vector<64x16xf32> -> vector<64x16xf32>
    %c0_51 = arith.constant 0 : index
    %c0_52 = arith.constant 0 : index
    %c0_53 = arith.constant 0 : index
    %49 = vector.load %arg10[%c0_51, %c0_52, %c0_53] : memref<1x1x16xf32, #tpu.memory_space<vmem>>, vector<1x1x16xf32>
    %50 = vector.shape_cast %49 : vector<1x1x16xf32> to vector<1x16xf32>
    %51 = vector.broadcast %50 : vector<1x16xf32> to vector<64x16xf32>
    %52 = arith.addf %48, %51 : vector<64x16xf32>
    %53 = arith.addf %52, %34 : vector<64x16xf32>
    %cst_54 = arith.constant 0.707106769 : f32
    %54 = vector.broadcast %cst_54 : f32 to vector<64x16xf32>
    %55 = arith.mulf %54, %53 : vector<64x16xf32>
    %c0_55 = arith.constant 0 : index
    %c0_56 = arith.constant 0 : index
    %56 = vector.load %arg12[%c0_55, %c0_56] : memref<64x16xf32, #tpu.memory_space<vmem>>, vector<64x16xf32>
    tpu.vector_store %arg12[%c0_55, %c0_56], %55 {strides = array<i32>} : memref<64x16xf32, #tpu.memory_space<vmem>>, vector<64x16xf32>,
    %c0_57 = arith.constant 0 : index
    %c0_58 = arith.constant 0 : index
    %c0_59 = arith.constant 0 : index
    %57 = vector.load %arg11[%c0_57, %c0_58, %c0_59] : memref<1x64x16xf32, #tpu.memory_space<vmem>>, vector<1x64x16xf32>
    %58 = vector.shape_cast %57 : vector<1x64x16xf32> to vector<64x16xf32>
    %59 = arith.addf %58, %55 : vector<64x16xf32>
    %c0_60 = arith.constant 0 : index
    %c0_61 = arith.constant 0 : index
    %c0_62 = arith.constant 0 : index
    %60 = vector.load %arg11[%c0_60, %c0_61, %c0_62] : memref<1x64x16xf32, #tpu.memory_space<vmem>>, vector<1x64x16xf32>
    %61 = vector.shape_cast %60 : vector<1x64x16xf32> to vector<64x16xf32>
    %62 = vector.shape_cast %59 : vector<64x16xf32> to vector<1x64x16xf32>
    tpu.vector_store %arg11[%c0_60, %c0_61, %c0_62], %62 {strides = array<i32>} : memref<1x64x16xf32, #tpu.memory_space<vmem>>, vector<1x64x16xf32>,
    return
  }
  func.func @transform_0(%arg0: i32, %arg1: i32) -> (i32, i32, i32) {
    %c0_i32 = arith.constant 0 : i32
    %c0_i32_0 = arith.constant 0 : i32
    %c0_i32_1 = arith.constant 0 : i32
    return %arg0, %c0_i32, %c0_i32_0 : i32, i32, i32
  }
  func.func @transform_1(%arg0: i32, %arg1: i32) -> (i32, i32, i32) {
    %c0_i32 = arith.constant 0 : i32
    %c0_i32_0 = arith.constant 0 : i32
    %c0_i32_1 = arith.constant 0 : i32
    return %arg1, %c0_i32, %c0_i32_0 : i32, i32, i32
  }
  func.func @transform_2(%arg0: i32, %arg1: i32) -> (i32, i32, i32) {
    %c0_i32 = arith.constant 0 : i32
    %c0_i32_0 = arith.constant 0 : i32
    %c0_i32_1 = arith.constant 0 : i32
    return %arg1, %c0_i32, %c0_i32_0 : i32, i32, i32
  }
  func.func @transform_3(%arg0: i32, %arg1: i32) -> (i32, i32, i32) {
    %c0_i32 = arith.constant 0 : i32
    %c0_i32_0 = arith.constant 0 : i32
    %c0_i32_1 = arith.constant 0 : i32
    return %arg1, %c0_i32, %c0_i32_0 : i32, i32, i32
  }
  func.func @transform_4(%arg0: i32, %arg1: i32) -> (i32, i32, i32) {
    %c0_i32 = arith.constant 0 : i32
    %c0_i32_0 = arith.constant 0 : i32
    %c0_i32_1 = arith.constant 0 : i32
    return %arg1, %c0_i32, %c0_i32_0 : i32, i32, i32
  }
  func.func @transform_5(%arg0: i32, %arg1: i32) -> (i32, i32, i32) {
    %c0_i32 = arith.constant 0 : i32
    %c0_i32_0 = arith.constant 0 : i32
    %c0_i32_1 = arith.constant 0 : i32
    return %arg1, %c0_i32, %c0_i32_0 : i32, i32, i32
  }
  func.func @transform_6(%arg0: i32, %arg1: i32) -> (i32, i32, i32) {
    %c0_i32 = arith.constant 0 : i32
    %c0_i32_0 = arith.constant 0 : i32
    %c0_i32_1 = arith.constant 0 : i32
    return %arg1, %c0_i32, %c0_i32_0 : i32, i32, i32
  }
  func.func @transform_7(%arg0: i32, %arg1: i32) -> (i32, i32, i32) {
    %c0_i32 = arith.constant 0 : i32
    %c0_i32_0 = arith.constant 0 : i32
    %c0_i32_1 = arith.constant 0 : i32
    return %arg1, %c0_i32, %c0_i32_0 : i32, i32, i32
  }
  func.func @transform_8(%arg0: i32, %arg1: i32) -> (i32, i32, i32) {
    %c0_i32 = arith.constant 0 : i32
    %c0_i32_0 = arith.constant 0 : i32
    %c0_i32_1 = arith.constant 0 : i32
    return %arg1, %c0_i32, %c0_i32_0 : i32, i32, i32
  }
  func.func @transform_9(%arg0: i32, %arg1: i32) -> (i32, i32, i32) {
    %c0_i32 = arith.constant 0 : i32
    %c0_i32_0 = arith.constant 0 : i32
    %c0_i32_1 = arith.constant 0 : i32
    return %arg0, %c0_i32, %c0_i32_0 : i32, i32, i32
  }
}

</mosaic_0001>

<bundles_post_ra>
// kernel: tpu_custom_call.1
= control target key start
LH: loop header
LB: loop body
LE: loop exit
PB: predicated region body
PF: predicated region fallthrough
CT: control target
= control target key end

     0   :  { %s1868_s30 = smov 0   ;;  %s1870_s10 = smov 0   ;;  %s2259_s0 = inlined_call_operand.vmem [shape: f32[2,64,16], index: 0, kind: input, shape index: {}]   ;;  %s2260_s1 = inlined_call_operand.vmem [shape: bf16[3,16,16], index: 1, kind: input, shape index: {}]   ;;  %s2261_s2 = inlined_call_operand.vmem [shape: f32[3,1,16], index: 2, kind: input, shape index: {}]   ;;  %s2262_s3 = inlined_call_operand.vmem [shape: bf16[3,96,16], index: 3, kind: input, shape index: {}]   ;;  %s2263_s4 = inlined_call_operand.vmem [shape: f32[3,1,16], index: 4, kind: input, shape index: {}]   ;;  %s2264_s5 = inlined_call_operand.vmem [shape: bf16[3,16,64], index: 5, kind: input, shape index: {}]   ;;  %s2265_s6 = inlined_call_operand.vmem [shape: f32[3,1,64], index: 6, kind: input, shape index: {}]   ;;  %s2266_s7 = inlined_call_operand.vmem [shape: bf16[3,64,16], index: 7, kind: input, shape index: {}]   ;;  %s2267_s8 = inlined_call_operand.vmem [shape: f32[3,1,16], index: 8, kind: input, shape index: {}]   ;;  %s2268_s9 = inlined_call_operand.vmem [shape: f32[2,64,16], index: 9, kind: output, shape index: {}]  }
   0x1   :  { %2271 = sst [smem:[#allocation8_spill]] %s2259_s0  ;;  %s1872_s11 = smov 0  }
   0x2   :  { %2272 = sst [smem:[#allocation9_spill]] %s2260_s1  ;;  %s1874_s12 = smov 0  }
   0x3   :  { %s1876_s13 = smov 0  }
   0x4 LB: > { %2273 = sst [smem:[#allocation4_spill]] %s1802_s11  ;;  %s28_s14 = sadd.s32 1, %s1802_s11  ;;  %s1810_s13 = sphi %s1876_s13, %s19_s13   ;;  %s1806_s12 = sphi %s1874_s12, %s2284_s12   ;;  %s1802_s11 = sphi %s1872_s11, %s2283_s11   ;;  %s1798_s10 = sphi %s1870_s10, %s2282_s10   ;;  %s1794_s30 = sphi %s1868_s30, %s2281_s30  }
   0x5   : > { %2274 = sst [smem:[#allocation5_spill]] %s1806_s12  ;;  %s31_s15 = sadd.s32 1, %s1806_s12 }
   0x6   : > { %p29_p0 = scmp.ge.s32.totalorder %s28_s14, 3  ;;  %p1477_p1 = scmp.ge.s32.totalorder %s1810_s13, 1 }
   0x7   : > { %p371_p2 = scmp.lt.s32.totalorder %s1810_s13, 7 }
   0x8   : > { %s2286_s14 = smov (%p29_p0, %s28_s14), 0  ;;  %s2288_s15 = smov (!%p29_p0, %s31_s15), %s1806_s12 }
   0x9   : > { %2275 = sst [smem:[#allocation6_spill]] %s2286_s14  ;;  %p372_p3 = pnand %p1477_p1, %p371_p2 }
   0xa   : > { %p33_p4 = scmp.ge.s32.totalorder %s2288_s15, 2  ;;  %p439_p5 = scmp.lt.s32.totalorder (!%p372_p3), %s1798_s10, 1 }
   0xb   : > { %375 = sbr.rel (%p372_p3) target bundleno = 1091 (0x443), region = 56  ;;  %p444_p6 = scmp.lt.s32.totalorder (!%p372_p3), %s1794_s30, 2 }
   0xc   : > { %s2290_s15 = smov (%p33_p4, %s2288_s15), 0  ;;  %s2277_s0 = sld [smem:[#allocation8_spill]] (!%p372_p3) }
   0xd   : > { %2276 = sst [smem:[#allocation7_spill]] %s2290_s15  ;;  %s2278_s1 = sld [smem:[#allocation9_spill]] (!%p372_p3) }
   0xe   : > { %p1489_p7 = scmp.ne.s32.totalorder (!%p372_p3), %s1794_s30, 0 }
  0x12   : > { %s2292_s10 = smov (!%p439_p5, %s1798_s10), 1  ;;  %vm494_vm0 = vcmask (!%p1489_p7), 130048  }
  0x13   : > { %s1902_s16 = scalar_select %p444_p6, %s1794_s30, 2 }
  0x14   : > { %s1524_s17 = sshll.u32 %s2292_s10, 6  ;;  %485 = sbr.rel (%p1489_p7) target bundleno = 31 (0x1f), region = 60 }
  0x15   : > { %s1907_s20 = scalar_lea.vmem %s2277_s0, %s1524_s17  ;;  %s1525_s21 = sshll.u32 %s1902_s16, 3 }
  0x16   : > { %s1913_s24 = scalar_lea.vmem %s2278_s1, %s1525_s21  ;;  %s1613_s28 = smul.u32 48, %s1902_s16  ;;  %v486_v0 = vld [vmem:[%s1907_s20] sm:$0xff] (!%p1489_p7)  ;;  %v487_v1 = vld [vmem:[%s1907_s20 + $0x8] sm:$0xff] (!%p1489_p7)  ;;  %v488_v2 = vld [vmem:[%s1907_s20 + $0x10] sm:$0xff] (!%p1489_p7) }
  0x17   : > { %s1927_s18 = scalar_lea.vmem %s2264_s5, %s1525_s21  ;;  %s467_s22 = scalar_lea.vmem %s2265_s6, %s1902_s16  ;;  %495 = vst.msk [vmem:[#allocation2] sm:$0xff] (!%p1489_p7), %vm494_vm0, %v486_v0  ;;  %496 = vst.msk [vmem:[#allocation2 + $0x8] sm:$0xff] (!%p1489_p7), %vm494_vm0, %v487_v1  ;;  %v489_v3 = vld [vmem:[%s1907_s20 + $0x18] sm:$0xff] (!%p1489_p7)  ;;  %v490_v4 = vld [vmem:[%s1907_s20 + $0x20] sm:$0xff] (!%p1489_p7) }
  0x18   : > { %s1936_s11 = scalar_lea.vmem %s2262_s3, %s1613_s28  ;;  %s1527_s25 = sshll.u32 %s1902_s16, 5  ;;  %497 = vst.msk [vmem:[#allocation2 + $0x10] sm:$0xff] (!%p1489_p7), %vm494_vm0, %v488_v2  ;;  %v491_v5 = vld [vmem:[%s1907_s20 + $0x28] sm:$0xff] (!%p1489_p7)  ;;  %498 = vst.msk [vmem:[#allocation2 + $0x18] sm:$0xff] (!%p1489_p7), %vm494_vm0, %v489_v3  ;;  %v492_v6 = vld [vmem:[%s1907_s20 + $0x30] sm:$0xff] (!%p1489_p7) }
  0x19   : > { %s1942_s15 = scalar_lea.vmem %s2266_s7, %s1527_s25  ;;  %s475_s12 = scalar_lea.vmem %s2267_s8, %s1902_s16  ;;  %499 = vst.msk [vmem:[#allocation2 + $0x20] sm:$0xff] (!%p1489_p7), %vm494_vm0, %v490_v4  ;;  %500 = vst.msk [vmem:[#allocation2 + $0x28] sm:$0xff] (!%p1489_p7), %vm494_vm0, %v491_v5  ;;  %v493_v7 = vld [vmem:[%s1907_s20 + $0x38] sm:$0xff] (!%p1489_p7) }
  0x1a   : > { %s1951_s0 = scalar_lea.vmem %s2268_s9, %s1524_s17  ;;  %501 = vst.msk [vmem:[#allocation2 + $0x30] sm:$0xff] (!%p1489_p7), %vm494_vm0, %v492_v6  ;;  %502 = vst.msk [vmem:[#allocation2 + $0x38] sm:$0xff] (!%p1489_p7), %vm494_vm0, %v493_v7 }
  0x1b   : > { %503 = vst.msk [vmem:[%s1951_s0] sm:$0xff] %vm494_vm0, %v486_v0  ;;  %504 = vst.msk [vmem:[%s1951_s0 + $0x8] sm:$0xff] %vm494_vm0, %v487_v1 }
  0x1c   : > { %505 = vst.msk [vmem:[%s1951_s0 + $0x10] sm:$0xff] %vm494_vm0, %v488_v2  ;;  %506 = vst.msk [vmem:[%s1951_s0 + $0x18] sm:$0xff] %vm494_vm0, %v489_v3 }
  0x1d   : > { %507 = vst.msk [vmem:[%s1951_s0 + $0x20] sm:$0xff] %vm494_vm0, %v490_v4  ;;  %508 = vst.msk [vmem:[%s1951_s0 + $0x28] sm:$0xff] %vm494_vm0, %v491_v5 }
  0x1e   : > { %509 = vst.msk [vmem:[%s1951_s0 + $0x30] sm:$0xff] %vm494_vm0, %v492_v6  ;;  %510 = vst.msk [vmem:[%s1951_s0 + $0x38] sm:$0xff] %vm494_vm0, %v493_v7 }
  0x1f PF: > { %v1760_v8 = vld [vmem:[%s1913_s24] sm:$0xff]   ;;  %vm538_vm1 = vcmask 130048   ;;  %vm617_vm2 = vcmask 123904   ;;  %v1812_v21 = vmov 0.0   ;;  %s2279_s17 = scalar_lea.vmem %s2261_s2, %s1902_s16  ;;  %v1762_v32 = vld [vmem:[%s1936_s11 + $0x8] sm:$0xff]   ;;  %v1763_v34 = vld [vmem:[%s1936_s11 + $0x10] sm:$0xff]   ;;  %s2280_s23 = scalar_lea.vmem %s2263_s4, %s1902_s16 }
  0x20   : > { %1557 = vmatprep.subr.bf16.mxu1 %v1760_v8  ;;  %623 = vst.msk [vmem:[#allocation3 + $0x30] sm:$0xff] %vm538_vm1, %v1812_v21  ;;  %616 = vst.msk [vmem:[#allocation3] sm:$0xff] %vm538_vm1, %v1812_v21  ;;  %v1490_v22 = vld [vmem:[%s2279_s17] ss:$0 sm:$0xff]  ;;  %s1813_s20 = smov 32   ;;  %s1814_s24 = smov 16  }
  0x21   : > { %1558 = vmatpush3.bf16.msra.mxu1 %v1760_v8  ;;  %624 = vst.msk [vmem:[#allocation3 + $0x38] sm:$0x3] %vm617_vm2, %v1812_v21  ;;  %618 = vst.msk [vmem:[#allocation3 + $0x8] sm:$0x3] %vm617_vm2, %v1812_v21  ;;  %v1761_v24 = vld [vmem:[%s1936_s11] sm:$0xff]   ;;  %v1764_v50 = vld [vmem:[%s1936_s11 + $0x18] sm:$0xff]  }
  0x22   : > { %v1987_v9 = vld [vmem:[#allocation2] sm:$0xff]  ;;  %v1989_v10 = vld [vmem:[#allocation2 + $0x8] sm:$0xff]  ;;  %619 = vst.msk [vmem:[#allocation3 + $0x10] sm:$0xff] %vm538_vm1, %v1812_v21  ;;  %621 = vst.msk [vmem:[#allocation3 + $0x20] sm:$0xff] %vm538_vm1, %v1812_v21  ;;  %1567 = vmatprep.subr.bf16.mxu1 %v1761_v24  ;;  %s1815_s27 = smov 48   ;;  %s1816_s28 = smov 64  }
  0x23   : > { %v1991_v11 = vld [vmem:[#allocation2 + $0x10] sm:$0xff]  ;;  %v519_v12 = vpack.c.bf16 %v1989_v10, %v1987_v9  ;;  %v1995_v13 = vld [vmem:[#allocation2 + $0x18] sm:$0xff]  ;;  %620 = vst.msk [vmem:[#allocation3 + $0x18] sm:$0x3] %vm617_vm2, %v1812_v21  ;;  %622 = vst.msk [vmem:[#allocation3 + $0x28] sm:$0x3] %vm617_vm2, %v1812_v21 }
  0x24   : > { %v1997_v14 = vld [vmem:[#allocation2 + $0x20] sm:$0xff]  ;;  %v1999_v15 = vld [vmem:[#allocation2 + $0x28] sm:$0xff]  ;;  %v520_v16 = vpack.c.bf16 %v1995_v13, %v1991_v11  ;;  %625 = vst.msk [vmem:[#allocation3 + $0x40] sm:$0xff] %vm538_vm1, %v1812_v21  ;;  %627 = vst.msk [vmem:[#allocation3 + $0x50] sm:$0xff] %vm538_vm1, %v1812_v21  ;;  %s1817_s10 = smov 80   ;;  %vm862_vm3 = vcmask 261120  }
  0x25   : > { %v521_v17 = vpack.c.bf16 %v1999_v15, %v1997_v14  ;;  %1559 = vmatprep.mubr.msk.bf16.mxu1 %vm538_vm1, %v519_v12  ;;  %v2006_v18 = vld [vmem:[#allocation2 + $0x30] sm:$0xff]  ;;  %v2008_v19 = vld [vmem:[#allocation2 + $0x38] sm:$0xff]  ;;  %626 = vst.msk [vmem:[#allocation3 + $0x48] sm:$0x3] %vm617_vm2, %v1812_v21  ;;  %628 = vst.msk [vmem:[#allocation3 + $0x58] sm:$0x3] %vm617_vm2, %v1812_v21 }
  0x26   : > { %1560 = vmatmul.mubr.msk.bf16.vlgmr.msra.gmra.mrb[0].mxu1 %vm538_vm1, %v520_v16  ;;  %v522_v20 = vpack.c.bf16 %v2008_v19, %v2006_v18  ;;  %629 = vst.msk [vmem:[#allocation3 + $0x60] sm:$0xff] %vm538_vm1, %v1812_v21  ;;  %631 = vst.msk [vmem:[#allocation3 + $0x70] sm:$0xff] %vm538_vm1, %v1812_v21  ;;  %v1765_v55 = vld [vmem:[%s1936_s11 + $0x20] sm:$0xff]   ;;  %v1766_v62 = vld [vmem:[%s1936_s11 + $0x28] sm:$0xff]   ;;  %vm871_vm4 = vcmask 392192   ;;  %vm880_vm5 = vcmask 523264  }
  0x27   : > { %1563 = vmatprep.mubr.msk.bf16.mxu1 %vm538_vm1, %v521_v17  ;;  %630 = vst.msk [vmem:[#allocation3 + $0x68] sm:$0x3] %vm617_vm2, %v1812_v21  ;;  %632 = vst.msk [vmem:[#allocation3 + $0x78] sm:$0x3] %vm617_vm2, %v1812_v21  ;;  %1568 = vmatpush3.bf16.msra.mxu1 %v1761_v24  ;;  %vm889_vm6 = vcmask 654336   ;;  %vm957_vm7 = vcmask 785408  }
  0x28   : > { %633 = vst.msk [vmem:[#allocation3 + $0x80] sm:$0xff] %vm538_vm1, %v1812_v21  ;;  %1569 = vmatprep.subr.bf16.mxu1 %v1762_v32  ;;  %v662_v37 = vld [vmem:[#allocation3 + $0x2] sm:$0xff] }
  0x29   : > { %634 = vst.msk [vmem:[#allocation3 + $0x88] sm:$0x3] %vm617_vm2, %v1812_v21  ;;  %v654_v38 = vld [vmem:[#allocation3 + $0x1] sm:$0xff] }
  0x2b   : > { %1570 = vmatpush3.bf16.msra.mxu1 %v1762_v32 }
  0x2c   : > { %1571 = vmatprep.subr.bf16.mxu1 %v1763_v34 }
  0x2e   : > { %1564 = vmatmul.mubr.msk.bf16.gmra.mrb[4].mxu1 %vm538_vm1, %v522_v20 }
  0x2f   : > { %1572 = vmatpush3.bf16.msra.mxu1 %v1763_v34 }
  0x30   : > { %1573 = vmatprep.subr.bf16.mxu1 %v1764_v50 }
  0x33   : > { %1574 = vmatpush3.bf16.msra.mxu1 %v1764_v50 }
  0x34   : > { %1575 = vmatprep.subr.bf16.mxu1 %v1765_v55 }
  0x37   : > { %1576 = vmatpush3.bf16.msra.mxu1 %v1765_v55 }
  0x38   : > { %1577 = vmatprep.subr.bf16.mxu1 %v1766_v62 }
  0x3b   : > { %1578 = vmatpush3.bf16.msra.mxu1 %v1766_v62 }
  0xf9   : > { %v1561_v23 = vpop.f32.mrb[0].mxu1 }
  0xfa   : > { %v594_v25 = vadd.f32 %v1561_v23, %v1490_v22  ;;  %v585_v26 = vpop.f32.mrb[1].mxu1 }
  0xfb   : > { %v586_v27 = vadd.f32 %v1490_v22, %v585_v26  ;;  %v1562_v28 = vpop.f32.mrb[2].mxu1 }
  0xfc   : > { %640 = vst.msk [vmem:[#allocation3 + $0x31] sm:$0xff] %vm538_vm1, %v594_v25  ;;  %v597_v29 = vadd.f32 %v1562_v28, %v1490_v22  ;;  %v588_v30 = vpop.f32.mrb[3].mxu1 }
  0xfd   : > { %638 = vst.msk [vmem:[#allocation3 + $0x11] sm:$0xff] %vm538_vm1, %v586_v27  ;;  %v589_v31 = vadd.f32 %v1490_v22, %v588_v30 }
  0xfe   : > { %641 = vst.msk [vmem:[#allocation3 + $0x41] sm:$0xff] %vm538_vm1, %v597_v29 }
  0xff   : > { %639 = vst.msk [vmem:[#allocation3 + $0x21] sm:$0xff] %vm538_vm1, %v589_v31 }
 0x101   : > { %v1565_v33 = vpop.f32.mrb[4].mxu1 }
 0x102   : > { %v610_v35 = vadd.f32 %v1565_v33, %v1490_v22  ;;  %v601_v36 = vpop.f32.mrb[5].mxu1 }
 0x103   : > { %v602_v39 = vadd.f32 %v1490_v22, %v601_v36  ;;  %v1566_v40 = vpop.f32.mrb[6].mxu1  ;;  %v2054_v51 = vld [vmem:[#allocation3 + $0x30] sm:$0xff] }
 0x104   : > { %644 = vst.msk [vmem:[#allocation3 + $0x71] sm:$0xff] %vm538_vm1, %v610_v35  ;;  %v663_v41 = vld [vmem:[#allocation3 + $0x12] sm:$0xff]  ;;  %v613_v43 = vadd.f32 %v1566_v40, %v1490_v22  ;;  %v604_v44 = vpop.f32.mrb[7].mxu1  ;;  %v646_v40 = vld [vmem:[#allocation3] sm:$0xff] }
 0x105   : > { %v655_v42 = vld [vmem:[#allocation3 + $0x11] sm:$0xff]  ;;  %642 = vst.msk [vmem:[#allocation3 + $0x51] sm:$0xff] %vm538_vm1, %v602_v39  ;;  %v1665_v45 = vpack.i.bf16 %v663_v41, %v662_v37  ;;  %v605_v47 = vadd.f32 %v1490_v22, %v604_v44  ;;  %v2047_v48 = vld [vmem:[#allocation3 + $0x40] sm:$0xff] }
 0x106   : > { %v1660_v46 = vpack.i.bf16 %v655_v42, %v654_v38  ;;  %v656_v49 = vld [vmem:[#allocation3 + $0x21] sm:$0xff]  ;;  %645 = vst.msk [vmem:[#allocation3 + $0x81] sm:$0xff] %vm538_vm1, %v613_v43  ;;  %v657_v52 = vld [vmem:[#allocation3 + $0x31] sm:$0xff]  ;;  %v1670_v53 = vpack.i.bf16 %v2047_v48, %v2054_v51 }
 0x107   : > { %1666 = vrot.lane.b32.xlu1 %v1665_v45, %s1813_s20  ;;  %643 = vst.msk [vmem:[#allocation3 + $0x61] sm:$0xff] %vm538_vm1, %v605_v47  ;;  %v1685_v54 = vpack.i.bf16 %v657_v52, %v656_v49  ;;  %v681_v56 = vld [vmem:[#allocation3 + $0x41] sm:$0xff]  ;;  %v2063_v58 = vld [vmem:[#allocation3 + $0x10] sm:$0xff]  ;;  %v1700_v1 = vpack.i.bf16 %v656_v49, %v655_v42 }
 0x108   : > { %1661 = vrot.lane.b32.xlu0 %v1660_v46, %s1814_s24  ;;  %v2059_v57 = vld [vmem:[#allocation3 + $0x20] sm:$0xff]  ;;  %v1675_v59 = vpack.i.bf16 %v681_v56, %v657_v52  ;;  %v688_v63 = vld [vmem:[#allocation3 + $0x32] sm:$0xff] }
 0x109   : > { %v1695_v60 = vpack.i.bf16 %v2059_v57, %v2063_v58  ;;  %v689_v61 = vld [vmem:[#allocation3 + $0x42] sm:$0xff] }
 0x10a   : > { %v1680_v0 = vpack.i.bf16 %v689_v61, %v688_v63  ;;  %v664_v2 = vld [vmem:[#allocation3 + $0x22] sm:$0xff] }
 0x10b   : > { %1671 = vrot.lane.b32.xlu1 %v1670_v53, %s1815_s27  ;;  %v2072_v3 = vld [vmem:[#allocation3 + $0x70] sm:$0xff]  ;;  %v1690_v5 = vpack.i.bf16 %v688_v63, %v664_v2  ;;  %v1705_v6 = vpack.i.bf16 %v664_v2, %v663_v41 }
 0x10c   : > { %1686 = vrot.lane.b32.xlu0 %v1685_v54, %s1814_s24  ;;  %v659_v7 = vld [vmem:[#allocation3 + $0x51] sm:$0xff] }
 0x10d   : > { %v677_v4 = vld [vmem:[#allocation3 + $0x80] sm:$0xff]  ;;  %v1710_v12 = vpack.i.bf16 %v659_v7, %v681_v56  ;;  %v684_v16 = vld [vmem:[#allocation3 + $0x71] sm:$0xff] }
 0x10e   : > { %v1720_v8 = vpack.i.bf16 %v677_v4, %v2072_v3  ;;  %v685_v17 = vld [vmem:[#allocation3 + $0x81] sm:$0xff]  ;;  %v667_v20 = vld [vmem:[#allocation3 + $0x52] sm:$0xff] }
 0x10f   : > { %1676 = vrot.lane.b32.xlu1 %v1675_v59, %s1816_s28  ;;  %v1725_v21 = vpack.i.bf16 %v685_v17, %v684_v16  ;;  %v1715_v22 = vpack.i.bf16 %v667_v20, %v689_v61  ;;  %v660_v23 = vld [vmem:[#allocation3 + $0x61] sm:$0xff]  ;;  %v2079_v24 = vld [vmem:[#allocation3 + $0x50] sm:$0xff] }
 0x110   : > { %1696 = vrot.lane.b32.xlu0 %v1695_v60, %s1815_s27  ;;  %v2081_v25 = vld [vmem:[#allocation3 + $0x60] sm:$0xff]  ;;  %v1730_v26 = vpack.i.bf16 %v684_v16, %v660_v23  ;;  %v669_v29 = vld [vmem:[#allocation3 + $0x72] sm:$0xff]  ;;  %v1745_v31 = vpack.i.bf16 %v660_v23, %v659_v7 }
 0x111   : > { %v1740_v27 = vpack.i.bf16 %v2081_v25, %v2079_v24  ;;  %v668_v28 = vld [vmem:[#allocation3 + $0x62] sm:$0xff] }
 0x112   : > { %v1735_v30 = vpack.i.bf16 %v669_v29, %v668_v28  ;;  %v693_v32 = vld [vmem:[#allocation3 + $0x82] sm:$0xff]  ;;  %v1750_v34 = vpack.i.bf16 %v668_v28, %v667_v20 }
 0x113   : > { %1681 = vrot.lane.b32.xlu1 %v1680_v0, %s1817_s10  ;;  %v1755_v33 = vpack.i.bf16 %v693_v32, %v669_v29 }
 0x114   : > { %1701 = vrot.lane.b32.xlu0 %v1700_v1, %s1816_s28 }
 0x117   : > { %1691 = vrot.lane.b32.xlu1 %v1690_v5, %s1813_s20 }
 0x118   : > { %1706 = vrot.lane.b32.xlu0 %v1705_v6, %s1817_s10 }
 0x11b   : > { %1721 = vrot.lane.b32.xlu1 %v1720_v8, %s1815_s27 }
 0x11c   : > { %1711 = vrot.lane.b32.xlu0 %v1710_v12, %s1814_s24 }
 0x11f   : > { %1726 = vrot.lane.b32.xlu1 %v1725_v21, %s1816_s28 }
 0x120   : > { %1716 = vrot.lane.b32.xlu0 %v1715_v22, %s1813_s20 }
 0x123   : > { %1731 = vrot.lane.b32.xlu1 %v1730_v26, %s1814_s24 }
 0x124   : > { %1741 = vrot.lane.b32.xlu0 %v1740_v27, %s1815_s27 }
 0x127   : > { %1736 = vrot.lane.b32.xlu1 %v1735_v30, %s1813_s20 }
 0x128   : > { %1746 = vrot.lane.b32.xlu0 %v1745_v31, %s1816_s28 }
 0x12b   : > { %1756 = vrot.lane.b32.xlu1 %v1755_v33, %s1817_s10 }
 0x12c   : > { %1751 = vrot.lane.b32.xlu0 %v1750_v34, %s1817_s10 }
 0x179   : > { %v1667_v35 = vpop.permute.xlu1 %1666 }
 0x17a   : > { %v1662_v36 = vpop.permute.xlu0 %1661  ;;  %v1668_v44 = vunpack.i.l.bf16 %v1667_v35  ;;  %v1669_v45 = vunpack.i.h.bf16 %v1667_v35 }
 0x17b   : > { %v1663_v39 = vunpack.i.l.bf16 %v1662_v36  ;;  %v1664_v41 = vunpack.i.h.bf16 %v1662_v36 }
 0x17d   : > { %v1672_v37 = vpop.permute.xlu1 %1671  ;;  %v854_v46 = vsel %vm538_vm1, %v646_v40, %v1663_v39  ;;  %v855_v49 = vsel %vm538_vm1, %v2063_v58, %v1664_v41 }
 0x17e   : > { %v1687_v38 = vpop.permute.xlu0 %1686  ;;  %v863_v56 = vsel %vm862_vm3, %v854_v46, %v1668_v44  ;;  %v1674_v61 = vunpack.i.h.bf16 %v1672_v37  ;;  %v1673_v62 = vunpack.i.l.bf16 %v1672_v37  ;;  %v864_v58 = vsel %vm862_vm3, %v855_v49, %v1669_v45 }
 0x17f   : > { %v1689_v47 = vunpack.i.h.bf16 %v1687_v38  ;;  %v1688_v50 = vunpack.i.l.bf16 %v1687_v38 }
 0x181   : > { %v1677_v42 = vpop.permute.xlu1 %1676  ;;  %v857_v63 = vsel %vm538_vm1, %v2054_v51, %v1689_v47  ;;  %v856_v0 = vsel %vm538_vm1, %v2059_v57, %v1688_v50 }
 0x182   : > { %v1697_v43 = vpop.permute.xlu0 %1696  ;;  %v1679_v1 = vunpack.i.h.bf16 %v1677_v42  ;;  %v1678_v17 = vunpack.i.l.bf16 %v1677_v42 }
 0x183   : > { %v1699_v52 = vunpack.i.h.bf16 %v1697_v43  ;;  %v1698_v53 = vunpack.i.l.bf16 %v1697_v43 }
 0x185   : > { %v1682_v54 = vpop.permute.xlu1 %1681  ;;  %v872_v2 = vsel %vm871_vm4, %v863_v56, %v1698_v53  ;;  %v873_v4 = vsel %vm871_vm4, %v864_v58, %v1699_v52 }
 0x186   : > { %v1702_v55 = vpop.permute.xlu0 %1701  ;;  %v1684_v20 = vunpack.i.h.bf16 %v1682_v54  ;;  %v1683_v27 = vunpack.i.l.bf16 %v1682_v54 }
 0x187   : > { %v1704_v59 = vunpack.i.h.bf16 %v1702_v55  ;;  %v1703_v60 = vunpack.i.l.bf16 %v1702_v55 }
 0x189   : > { %v1692_v5 = vpop.permute.xlu1 %1691  ;;  %v881_v51 = vsel %vm880_vm5, %v872_v2, %v1703_v60  ;;  %v882_v21 = vsel %vm880_vm5, %v873_v4, %v1704_v59 }
 0x18a   : > { %v1707_v6 = vpop.permute.xlu0 %1706  ;;  %v1694_v7 = vunpack.i.h.bf16 %v1692_v5  ;;  %v1693_v8 = vunpack.i.l.bf16 %v1692_v5 }
 0x18b   : > { %v1709_v12 = vunpack.i.h.bf16 %v1707_v6  ;;  %v1708_v16 = vunpack.i.l.bf16 %v1707_v6 }
 0x18c   : > { %v865_v22 = vsel %vm862_vm3, %v856_v0, %v1693_v8  ;;  %v866_v57 = vsel %vm862_vm3, %v857_v63, %v1694_v7 }
 0x18d   : > { %v890_v23 = vsel %vm889_vm6, %v881_v51, %v1708_v16  ;;  %v891_v26 = vsel %vm889_vm6, %v882_v21, %v1709_v12  ;;  %v874_v28 = vsel %vm871_vm4, %v865_v22, %v1673_v62  ;;  %v875_v29 = vsel %vm871_vm4, %v866_v57, %v1674_v61  ;;  %v1722_v31 = vpop.permute.xlu1 %1721 }
 0x18e   : > { %v898_v30 = vpack.c.bf16 %v891_v26, %v890_v23  ;;  %v1712_v32 = vpop.permute.xlu0 %1711  ;;  %v883_v33 = vsel %vm880_vm5, %v874_v28, %v1678_v17  ;;  %v884_v34 = vsel %vm880_vm5, %v875_v29, %v1679_v1  ;;  %v1724_v46 = vunpack.i.h.bf16 %v1722_v31 }
 0x18f   : > { %v892_v35 = vsel %vm889_vm6, %v883_v33, %v1683_v27  ;;  %v893_v36 = vsel %vm889_vm6, %v884_v34, %v1684_v20  ;;  %v1714_v40 = vunpack.i.h.bf16 %v1712_v32  ;;  %v1713_v41 = vunpack.i.l.bf16 %v1712_v32  ;;  %v1767_v32 = vld [vmem:[%s1927_s18] sm:$0xff]  }
 0x190   : > { %1579 = vmatprep.mubr.msk.bf16.mxu1 %vm957_vm7, %v898_v30  ;;  %v899_v37 = vpack.c.bf16 %v893_v36, %v892_v35  ;;  %v1723_v47 = vunpack.i.l.bf16 %v1722_v31  ;;  %1587 = vmatprep.subr.bf16.mxu0 %v1767_v32  ;;  %v1768_v33 = vld [vmem:[%s1942_s15] sm:$0xff]  }
 0x191   : > { %v1727_v38 = vpop.permute.xlu1 %1726  ;;  %v859_v49 = vsel %vm538_vm1, %v2079_v24, %v1714_v40  ;;  %v858_v50 = vsel %vm538_vm1, %v2047_v48, %v1713_v41  ;;  %1588 = vmatpush3.bf16.msra.mxu0 %v1767_v32  ;;  %v1496_v34 = vld [vmem:[%s2280_s23] ss:$0 sm:$0xff] }
 0x192   : > { %v1717_v39 = vpop.permute.xlu0 %1716  ;;  %1580 = vmatmul.mubr.msk.bf16.vlgmr.msra.gmra.mrb[8].mxu1 %vm957_vm7, %v899_v37  ;;  %v1729_v56 = vunpack.i.h.bf16 %v1727_v38  ;;  %v1728_v59 = vunpack.i.l.bf16 %v1727_v38  ;;  %1597 = vmatprep.subr.bf16.mxu0 %v1768_v33 }
 0x193   : > { %v1719_v52 = vunpack.i.h.bf16 %v1717_v39  ;;  %v1718_v53 = vunpack.i.l.bf16 %v1717_v39 }
 0x195   : > { %v1732_v42 = vpop.permute.xlu1 %1731  ;;  %v867_v4 = vsel %vm862_vm3, %v858_v50, %v1718_v53  ;;  %v868_v5 = vsel %vm862_vm3, %v859_v49, %v1719_v52 }
 0x196   : > { %v1742_v43 = vpop.permute.xlu0 %1741  ;;  %v1734_v44 = vunpack.i.h.bf16 %v1732_v42  ;;  %v1733_v45 = vunpack.i.l.bf16 %v1732_v42 }
 0x197   : > { %v1744_v58 = vunpack.i.h.bf16 %v1742_v43  ;;  %v1743_v0 = vunpack.i.l.bf16 %v1742_v43 }
 0x198   : > { %v861_v62 = vsel %vm538_vm1, %v2072_v3, %v1734_v44  ;;  %v860_v63 = vsel %vm538_vm1, %v2081_v25, %v1733_v45 }
 0x199   : > { %v1737_v54 = vpop.permute.xlu1 %1736  ;;  %v876_v20 = vsel %vm871_vm4, %v867_v4, %v1743_v0  ;;  %v877_v51 = vsel %vm871_vm4, %v868_v5, %v1744_v58 }
 0x19a   : > { %v1747_v55 = vpop.permute.xlu0 %1746  ;;  %v1739_v60 = vunpack.i.h.bf16 %v1737_v54  ;;  %v1738_v61 = vunpack.i.l.bf16 %v1737_v54  ;;  %v1769_v54 = vld [vmem:[%s1942_s15 + $0x8] sm:$0xff]  }
 0x19b   : > { %v1749_v1 = vunpack.i.h.bf16 %v1747_v55  ;;  %v1748_v2 = vunpack.i.l.bf16 %v1747_v55 }
 0x19c   : > { %v869_v24 = vsel %vm862_vm3, %v860_v63, %v1738_v61  ;;  %v870_v48 = vsel %vm862_vm3, %v861_v62, %v1739_v60 }
 0x19d   : > { %v878_v6 = vsel %vm871_vm4, %v869_v24, %v1723_v47  ;;  %v879_v7 = vsel %vm871_vm4, %v870_v48, %v1724_v46  ;;  %v1757_v3 = vpop.permute.xlu1 %1756  ;;  %v885_v57 = vsel %vm880_vm5, %v876_v20, %v1748_v2  ;;  %v886_v23 = vsel %vm880_vm5, %v877_v51, %v1749_v1 }
 0x19e   : > { %v1752_v8 = vpop.permute.xlu0 %1751  ;;  %v1759_v12 = vunpack.i.h.bf16 %v1757_v3  ;;  %v1758_v25 = vunpack.i.l.bf16 %v1757_v3  ;;  %v887_v16 = vsel %vm880_vm5, %v878_v6, %v1728_v59  ;;  %v888_v17 = vsel %vm880_vm5, %v879_v7, %v1729_v56 }
 0x19f   : > { %v1754_v21 = vunpack.i.h.bf16 %v1752_v8  ;;  %v1753_v22 = vunpack.i.l.bf16 %v1752_v8 }
 0x1a0   : > { %v896_v26 = vsel %vm889_vm6, %v887_v16, %v1758_v25  ;;  %v897_v27 = vsel %vm889_vm6, %v888_v17, %v1759_v12 }
 0x1a1   : > { %v901_v28 = vpack.c.bf16 %v897_v27, %v896_v26  ;;  %v894_v29 = vsel %vm889_vm6, %v885_v57, %v1753_v22  ;;  %v895_v30 = vsel %vm889_vm6, %v886_v23, %v1754_v21 }
 0x1a2   : > { %v900_v31 = vpack.c.bf16 %v895_v30, %v894_v29 }
 0x1a4   : > { %1583 = vmatprep.mubr.msk.bf16.mxu1 %vm957_vm7, %v900_v31 }
 0x1a5   : > { %1584 = vmatmul.mubr.msk.bf16.gmra.mrb[12].mxu1 %vm957_vm7, %v901_v28 }
 0x265   : > { %v1581_v35 = vpop.f32.mrb[8].mxu1 }
 0x266   : > { %v1013_v36 = vadd.f32 %v1581_v35, %v1496_v34  ;;  %v1004_v37 = vpop.f32.mrb[9].mxu1 }
 0x267   : > { %v1005_v38 = vadd.f32 %v1496_v34, %v1004_v37  ;;  %v1582_v39 = vpop.f32.mrb[10].mxu1 }
 0x268   : > { %v1016_v40 = vadd.f32 %v1582_v39, %v1496_v34  ;;  %v1007_v41 = vpop.f32.mrb[11].mxu1  ;;  %v1037_v44 = vadd.f32 %v1013_v36, %v1991_v11  ;;  %v1513_v39 = vld [vmem:[%s475_s12] ss:$0 sm:$0xff] }
 0x269   : > { %v1035_v42 = vadd.f32 %v1005_v38, %v1987_v9  ;;  %v1008_v43 = vadd.f32 %v1496_v34, %v1007_v41 }
 0x26a   : > { %v1038_v45 = vadd.f32 %v1016_v40, %v1995_v13  ;;  %v2161_v52 = vmul.f32 0.70710677, %v1037_v44 }
 0x26b   : > { %v1036_v46 = vadd.f32 %v1008_v43, %v1989_v10  ;;  %v2157_v49 = vmul.f32 0.70710677, %v1035_v42 }
 0x26c   : > { %v2155_v47 = vmul.f32 0.70710677, %v1038_v45 }
 0x26d   : > { %v2159_v50 = vmul.f32 0.70710677, %v1036_v46 }
 0x26e   : > { %v1052_v9 = vpack.c.bf16 %v2155_v47, %v2161_v52 }
 0x26f   : > { %v1051_v53 = vpack.c.bf16 %v2159_v50, %v2157_v49 }
 0x271   : > { %1589 = vmatprep.mubr.msk.bf16.mxu0 %vm538_vm1, %v1051_v53 }
 0x272   : > { %1590 = vmatmul.mubr.msk.bf16.vlgmr.msra.gmra.mrb[0].mxu0 %vm538_vm1, %v1052_v9  ;;  %v1301_v9 = vld [vmem:[%s1951_s0 + $0x10] sm:$0xff] }
 0x273   : > { %1598 = vmatpush3.bf16.msra.mxu0 %v1768_v33 }
 0x274   : > { %1599 = vmatprep.subr.bf16.mxu0 %v1769_v54 }
 0x277   : > { %1600 = vmatpush3.bf16.msra.mxu0 %v1769_v54 }
 0x278   : > { %v1585_v10 = vpop.f32.mrb[12].mxu1 }
 0x279   : > { %v1029_v11 = vadd.f32 %v1585_v10, %v1496_v34  ;;  %v1020_v13 = vpop.f32.mrb[13].mxu1 }
 0x27a   : > { %v1021_v55 = vadd.f32 %v1496_v34, %v1020_v13  ;;  %v1586_v56 = vpop.f32.mrb[14].mxu1  ;;  %v1299_v13 = vld [vmem:[%s1951_s0] sm:$0xff] }
 0x27b   : > { %v1032_v59 = vadd.f32 %v1586_v56, %v1496_v34  ;;  %v1023_v60 = vpop.f32.mrb[15].mxu1  ;;  %v1041_v63 = vadd.f32 %v1029_v11, %v2006_v18  ;;  %v1770_v18 = vld [vmem:[%s1942_s15 + $0x10] sm:$0xff]  }
 0x27c   : > { %v1039_v61 = vadd.f32 %v1021_v55, %v1997_v14  ;;  %v1024_v62 = vadd.f32 %v1496_v34, %v1023_v60  ;;  %1601 = vmatprep.subr.bf16.mxu0 %v1770_v18 }
 0x27d   : > { %v1042_v58 = vadd.f32 %v1032_v59, %v2008_v19  ;;  %v2180_v2 = vmul.f32 0.70710677, %v1041_v63  ;;  %1602 = vmatpush3.bf16.msra.mxu0 %v1770_v18  ;;  %v1507_v19 = vld [vmem:[%s467_s22] ss:$0 sm:$0xff]  ;;  %v1302_v59 = vld [vmem:[%s1951_s0 + $0x18] sm:$0xff] }
 0x27e   : > { %v1040_v0 = vadd.f32 %v1024_v62, %v1999_v15  ;;  %v2176_v48 = vmul.f32 0.70710677, %v1039_v61  ;;  %v1771_v15 = vld [vmem:[%s1942_s15 + $0x18] sm:$0xff]   ;;  %v1300_v62 = vld [vmem:[%s1951_s0 + $0x8] sm:$0xff] }
 0x27f   : > { %v2174_v24 = vmul.f32 0.70710677, %v1042_v58  ;;  %1603 = vmatprep.subr.bf16.mxu0 %v1771_v15 }
 0x280   : > { %v2178_v1 = vmul.f32 0.70710677, %v1040_v0 }
 0x281   : > { %v1054_v4 = vpack.c.bf16 %v2174_v24, %v2180_v2  ;;  %1604 = vmatpush3.bf16.msra.mxu0 %v1771_v15 }
 0x282   : > { %v1053_v14 = vpack.c.bf16 %v2178_v1, %v2176_v48 }
 0x284   : > { %1593 = vmatprep.mubr.msk.bf16.mxu0 %vm538_vm1, %v1053_v14 }
 0x285   : > { %1594 = vmatmul.mubr.msk.bf16.gmra.mrb[4].mxu0 %vm538_vm1, %v1054_v4 }
 0x345   : > { %v1591_v5 = vpop.f32.mrb[0].mxu0 }
 0x346   : > { %v1125_v6 = vadd.f32 %v1591_v5, %v1507_v19  ;;  %v1116_v7 = vpop.f32.mrb[1].mxu0 }
 0x347   : > { %v1117_v3 = vadd.f32 %v1507_v19, %v1116_v7  ;;  %v1592_v8 = vpop.f32.mrb[2].mxu0 }
 0x348   : > { %v1128_v12 = vadd.f32 %v1592_v8, %v1507_v19  ;;  %v1119_v25 = vpop.f32.mrb[3].mxu0  ;;  %v1149_v17 = vmax.f32 %v1125_v6, 0.0  ;;  %v1305_v6 = vld [vmem:[%s1951_s0 + $0x30] sm:$0xff] }
 0x349   : > { %v1120_v16 = vadd.f32 %v1507_v19, %v1119_v25  ;;  %v1147_v51 = vmax.f32 %v1117_v3, 0.0 }
 0x34a   : > { %v1150_v20 = vmax.f32 %v1128_v12, 0.0  ;;  %v1303_v12 = vld [vmem:[%s1951_s0 + $0x20] sm:$0xff] }
 0x34b   : > { %v1148_v21 = vmax.f32 %v1120_v16, 0.0 }
 0x34c   : > { %v1156_v22 = vpack.c.bf16 %v1150_v20, %v1149_v17  ;;  %v1306_v17 = vld [vmem:[%s1951_s0 + $0x38] sm:$0xff] }
 0x34d   : > { %v1155_v57 = vpack.c.bf16 %v1148_v21, %v1147_v51  ;;  %v1304_v21 = vld [vmem:[%s1951_s0 + $0x28] sm:$0xff] }
 0x34f   : > { %1605 = vmatprep.mubr.msk.bf16.mxu0 %vm880_vm5, %v1155_v57 }
 0x350   : > { %1606 = vmatmul.mubr.msk.bf16.vlgmr.msra.gmra.mrb[8].mxu0 %vm880_vm5, %v1156_v22 }
 0x358   : > { %v1595_v23 = vpop.f32.mrb[4].mxu0 }
 0x359   : > { %v1141_v26 = vadd.f32 %v1595_v23, %v1507_v19  ;;  %v1132_v27 = vpop.f32.mrb[5].mxu0 }
 0x35a   : > { %v1133_v28 = vadd.f32 %v1507_v19, %v1132_v27  ;;  %v1596_v29 = vpop.f32.mrb[6].mxu0 }
 0x35b   : > { %v1144_v30 = vadd.f32 %v1596_v29, %v1507_v19  ;;  %v1135_v31 = vpop.f32.mrb[7].mxu0  ;;  %v1153_v33 = vmax.f32 %v1141_v26, 0.0 }
 0x35c   : > { %v1136_v32 = vadd.f32 %v1507_v19, %v1135_v31  ;;  %v1151_v35 = vmax.f32 %v1133_v28, 0.0 }
 0x35d   : > { %v1154_v34 = vmax.f32 %v1144_v30, 0.0 }
 0x35e   : > { %v1152_v36 = vmax.f32 %v1136_v32, 0.0 }
 0x35f   : > { %v1158_v37 = vpack.c.bf16 %v1154_v34, %v1153_v33 }
 0x360   : > { %v1157_v38 = vpack.c.bf16 %v1152_v36, %v1151_v35 }
 0x362   : > { %1609 = vmatprep.mubr.msk.bf16.mxu0 %vm880_vm5, %v1157_v38 }
 0x363   : > { %1610 = vmatmul.mubr.msk.bf16.gmra.mrb[12].mxu0 %vm880_vm5, %v1158_v37 }
 0x423   : > { %v1607_v40 = vpop.f32.mrb[8].mxu0 }
 0x424   : > { %v1253_v41 = vadd.f32 %v1607_v40, %v1513_v39  ;;  %v1244_v42 = vpop.f32.mrb[9].mxu0 }
 0x425   : > { %v1245_v43 = vadd.f32 %v1513_v39, %v1244_v42  ;;  %v1608_v44 = vpop.f32.mrb[10].mxu0 }
 0x426   : > { %v1277_v45 = vadd.f32 %v1253_v41, %v2161_v52  ;;  %v1256_v46 = vadd.f32 %v1608_v44, %v1513_v39  ;;  %v1247_v53 = vpop.f32.mrb[11].mxu0 }
 0x427   : > { %v1275_v54 = vadd.f32 %v1245_v43, %v2157_v49  ;;  %v1248_v10 = vadd.f32 %v1513_v39, %v1247_v53 }
 0x428   : > { %v1285_v11 = vmul.f32 0.70710677, %v1277_v45  ;;  %v1278_v55 = vadd.f32 %v1256_v46, %v2155_v47 }
 0x429   : > { %v1283_v56 = vmul.f32 0.70710677, %v1275_v54  ;;  %v1276_v60 = vadd.f32 %v1248_v10, %v2159_v50 }
 0x42a   : > { %1293 = vst.msk [vmem:[#allocation2 + $0x10] sm:$0xff] %vm538_vm1, %v1285_v11  ;;  %v1309_v52 = vadd.f32 %v1301_v9, %v1285_v11  ;;  %v1286_v61 = vmul.f32 0.70710677, %v1278_v55 }
 0x42b   : > { %1291 = vst.msk [vmem:[#allocation2] sm:$0xff] %vm538_vm1, %v1283_v56  ;;  %v1307_v49 = vadd.f32 %v1299_v13, %v1283_v56  ;;  %v1284_v63 = vmul.f32 0.70710677, %v1276_v60 }
 0x42c   : > { %1317 = vst.msk [vmem:[%s1951_s0 + $0x10] sm:$0xff] %vm538_vm1, %v1309_v52  ;;  %1294 = vst.msk [vmem:[#allocation2 + $0x18] sm:$0xff] %vm538_vm1, %v1286_v61  ;;  %v1310_v47 = vadd.f32 %v1302_v59, %v1286_v61 }
 0x42d   : > { %1315 = vst.msk [vmem:[%s1951_s0] sm:$0xff] %vm538_vm1, %v1307_v49  ;;  %1292 = vst.msk [vmem:[#allocation2 + $0x8] sm:$0xff] %vm538_vm1, %v1284_v63  ;;  %v1308_v50 = vadd.f32 %v1300_v62, %v1284_v63 }
 0x42e   : > { %1318 = vst.msk [vmem:[%s1951_s0 + $0x18] sm:$0xff] %vm538_vm1, %v1310_v47 }
 0x42f   : > { %1316 = vst.msk [vmem:[%s1951_s0 + $0x8] sm:$0xff] %vm538_vm1, %v1308_v50 }
 0x436   : > { %v1611_v58 = vpop.f32.mrb[12].mxu0 }
 0x437   : > { %v1269_v0 = vadd.f32 %v1611_v58, %v1513_v39  ;;  %v1260_v14 = vpop.f32.mrb[13].mxu0 }
 0x438   : > { %v1261_v4 = vadd.f32 %v1513_v39, %v1260_v14  ;;  %v1612_v18 = vpop.f32.mrb[14].mxu0 }
 0x439   : > { %v1281_v15 = vadd.f32 %v1269_v0, %v2180_v2  ;;  %v1272_v19 = vadd.f32 %v1612_v18, %v1513_v39  ;;  %v1263_v5 = vpop.f32.mrb[15].mxu0 }
 0x43a   : > { %v1279_v7 = vadd.f32 %v1261_v4, %v2176_v48  ;;  %v1264_v3 = vadd.f32 %v1513_v39, %v1263_v5 }
 0x43b   : > { %v1289_v8 = vmul.f32 0.70710677, %v1281_v15  ;;  %v1282_v25 = vadd.f32 %v1272_v19, %v2174_v24 }
 0x43c   : > { %v1287_v16 = vmul.f32 0.70710677, %v1279_v7  ;;  %v1280_v20 = vadd.f32 %v1264_v3, %v2178_v1 }
 0x43d   : > { %1297 = vst.msk [vmem:[#allocation2 + $0x30] sm:$0xff] %vm538_vm1, %v1289_v8  ;;  %v1313_v2 = vadd.f32 %v1305_v6, %v1289_v8  ;;  %v1290_v51 = vmul.f32 0.70710677, %v1282_v25 }
 0x43e   : > { %1295 = vst.msk [vmem:[#allocation2 + $0x20] sm:$0xff] %vm538_vm1, %v1287_v16  ;;  %v1311_v48 = vadd.f32 %v1303_v12, %v1287_v16  ;;  %v1288_v22 = vmul.f32 0.70710677, %v1280_v20 }
 0x43f   : > { %1321 = vst.msk [vmem:[%s1951_s0 + $0x30] sm:$0xff] %vm538_vm1, %v1313_v2  ;;  %1298 = vst.msk [vmem:[#allocation2 + $0x38] sm:$0xff] %vm538_vm1, %v1290_v51  ;;  %v1314_v24 = vadd.f32 %v1306_v17, %v1290_v51 }
 0x440   : > { %1319 = vst.msk [vmem:[%s1951_s0 + $0x20] sm:$0xff] %vm538_vm1, %v1311_v48  ;;  %1296 = vst.msk [vmem:[#allocation2 + $0x28] sm:$0xff] %vm538_vm1, %v1288_v22  ;;  %v1312_v57 = vadd.f32 %v1304_v21, %v1288_v22 }
 0x441   : > { %1322 = vst.msk [vmem:[%s1951_s0 + $0x38] sm:$0xff] %vm538_vm1, %v1314_v24 }
 0x442   : > { %1320 = vst.msk [vmem:[%s1951_s0 + $0x28] sm:$0xff] %vm538_vm1, %v1312_v57 }
 0x443 PF: > { %s19_s13 = sadd.s32 1, %s1810_s13   ;;  %s2281_s30 = sld [smem:[#allocation4_spill]] }
 0x444   : > { %p16_p8 = scmp.ge.s32.totalorder %s19_s13, 8   ;;  %s2282_s10 = sld [smem:[#allocation5_spill]] }
 0x445   : > { %s2283_s11 = sld [smem:[#allocation6_spill]]  ;;  %s2284_s12 = sld [smem:[#allocation7_spill]] }
 0x446   :  { %18 = sbr.rel (!%p16_p8) target bundleno = 4 (0x4), region = 115 }

</bundles_post_ra>
